<compile_context>
chip_gen: v7x
topology: tpu7x:2x2x1
jax: 0.10.0
libtpu: 0.0.40
codegen_flags: <defaults>
</compile_context>

<pallas_src>
import functools

import jax
import jax.numpy as jnp
from jax import lax
from jax.experimental import pallas as pl
from jax.experimental.pallas import tpu as pltpu


def _round_up(x, m):
    return ((x + m - 1) // m) * m


def _focal_loss_kernel(logits_ref, targets_ref, partial_ref, *, gamma, tile_n, n):
    i = pl.program_id(0)

    # Validity mask for the ragged last tile.  Pallas leaves the out-of-bounds
    # rows of the final block unspecified, so sanitize them BEFORE max/exp:
    # exp(garbage) can be inf, and inf * 0 = NaN would survive the final mask.
    row = lax.broadcasted_iota(jnp.int32, (tile_n, 1), 0)
    valid = (i * tile_n + row) < n                          # (tile_n, 1) bool

    x = logits_ref[...].astype(jnp.float32)                 # (tile_n, C)
    x = jnp.where(valid, x, 0.0)
    tgt = targets_ref[...]                                   # (tile_n, 1) int32

    # Numerically stable log-softmax, extracting only the target column
    # (no full (tile_n, C) log_probs / one-hot materialized).
    m = jnp.max(x, axis=-1, keepdims=True)                   # (tile_n, 1)
    shifted = x - m                                           # (tile_n, C)
    sumexp = jnp.sum(jnp.exp(shifted), axis=-1, keepdims=True)
    col = lax.broadcasted_iota(jnp.int32, x.shape, 1)
    tgt_shifted = jnp.sum(jnp.where(col == tgt, shifted, 0.0),
                          axis=-1, keepdims=True)             # (tile_n, 1)
    tgt_logp = tgt_shifted - jnp.log(sumexp)                  # log p_target
    pt = jnp.exp(tgt_logp)                                    # = exp(-ce)
    ce = -tgt_logp                                            # cross_entropy 'none'

    one_minus_pt = 1.0 - pt
    g = float(gamma)
    if g == 2.0:
        w = jnp.square(one_minus_pt)                          # single VPU multiply
    elif g.is_integer() and g >= 0.0:
        w = lax.integer_pow(one_minus_pt, int(g))
    else:
        # non-integer gamma: clamp to avoid pow(negative) when pt rounds > 1
        w = jnp.power(jnp.maximum(one_minus_pt, 0.0), g)

    focal = w * ce                                            # (tile_n, 1)
    partial_ref[0, 0] = jnp.sum(focal * valid.astype(jnp.float32))


def focal_loss(logits, targets, alpha=1.0, gamma=2.0, reduction="mean", tile_n=None):
    """logits: (N, C) float32/bf16, targets: (N,) int class indices -> scalar f32."""
    n, c = logits.shape
    targets2d = targets.astype(jnp.int32).reshape(n, 1)
    itemsize = jnp.dtype(logits.dtype).itemsize

    # ---- per-generation VMEM budget -------------------------------------
    try:
        vmem_phys = int(pltpu.get_tpu_info().vmem_capacity_bytes)
    except Exception:
        vmem_phys = 64 * 1024 * 1024          # conservative (v7x-sized) fallback
    # ~1/3 of physical for the streamed logits tiles + intermediates:
    # ~21 MiB on v7x (64 MiB/TC), ~42 MiB on v5e/v6e (128 MiB).
    vmem_budget = min(vmem_phys // 3, 48 * 1024 * 1024)

    # Per-row VMEM footprint: double-buffered logits tile (input dtype)
    # + ~3 f32 intermediates (x, shifted, exp) + double-buffered targets row
    # (lane-padded to 128 in VMEM).
    c_pad = _round_up(c, 128)
    bytes_per_row = 2 * itemsize * c_pad + 3 * 4 * c_pad + 2 * 4 * 128
    max_tile = max(8, (vmem_budget // bytes_per_row) // 8 * 8)

    if tile_n is None:
        tile_n = max_tile
    tile_n = int(max(8, min(tile_n, max_tile)))
    # Never larger than the (8-aligned) batch, and keep num_tiles >= 2 so the
    # "parallel" grid axis can be sharded across both TensorCores on v7x.
    tile_n = min(tile_n, _round_up(n, 8))
    tile_n = max(8, min(tile_n, _round_up((n + 1) // 2, 8)))
    num_tiles = (n + tile_n - 1) // tile_n

    kernel = functools.partial(
        _focal_loss_kernel, gamma=float(gamma), tile_n=tile_n, n=n
    )

    cost = pl.CostEstimate(
        flops=6 * n * c,
        transcendentals=n * c + 2 * n,
        bytes_accessed=n * c * itemsize + n * 4 + num_tiles * 4,
    )

    vmem_limit = int(min(vmem_phys * 3 // 4, 96 * 1024 * 1024))

    partials = pl.pallas_call(
        kernel,
        out_shape=jax.ShapeDtypeStruct((1, num_tiles), jnp.float32),
        grid_spec=pltpu.PrefetchScalarGridSpec(
            num_scalar_prefetch=0,
            grid=(num_tiles,),
            in_specs=[
                pl.BlockSpec((tile_n, c), lambda i: (i, 0)),   # logits tile (VMEM)
                pl.BlockSpec((tile_n, 1), lambda i: (i, 0)),   # targets tile (VMEM)
            ],
            out_specs=pl.BlockSpec(
                (1, 1), lambda i: (0, i), memory_space=pltpu.SMEM
            ),
        ),
        compiler_params=pltpu.CompilerParams(
            dimension_semantics=("parallel",),
            vmem_limit_bytes=vmem_limit,
        ),
        cost_estimate=cost,
    )(logits, targets2d)

    total = jnp.sum(partials)
    if reduction == "mean":
        return alpha * total / jnp.float32(n)
    elif reduction == "sum":
        return alpha * total
    else:
        # TODO(synk): reduction='none' would need a per-sample (N,) output spec.
        raise NotImplementedError("reduction='none' not supported by this kernel")


def _reference(logits, targets, alpha=1.0, gamma=2.0):
    logp = jax.nn.log_softmax(logits.astype(jnp.float32), axis=-1)
    ce = -jnp.take_along_axis(logp, targets[:, None], axis=-1)[:, 0]
    pt = jnp.exp(-ce)
    return jnp.mean(alpha * (1.0 - pt) ** gamma * ce)


if __name__ == "__main__":
    key = jax.random.PRNGKey(0)
    k1, k2, k3, k4 = jax.random.split(key, 4)

    # Small shape consistent with the module (batch of logits over C classes).
    N, C = 8, 32
    logits = jax.random.normal(k1, (N, C), dtype=jnp.float32)
    targets = jax.random.randint(k2, (N,), 0, C, dtype=jnp.int32)

    out = focal_loss(logits, targets, alpha=1.0, gamma=2.0)
    out = jax.block_until_ready(out)
    ref = _reference(logits, targets)
    assert jnp.allclose(out, ref, atol=1e-5, rtol=1e-5), (out, ref)

    # Multi-tile path: auto-sizer clamps to 2 tiles; last block is ragged and
    # exercises the in-kernel sanitize + mask (no wrapper-side padding copy).
    N2, C2 = 200, 32
    logits2 = jax.random.normal(k3, (N2, C2), dtype=jnp.float32)
    targets2 = jax.random.randint(k4, (N2,), 0, C2, dtype=jnp.int32)
    out2 = focal_loss(logits2, targets2, alpha=1.0, gamma=2.0)
    out2 = jax.block_until_ready(out2)
    ref2 = _reference(logits2, targets2)
    assert jnp.allclose(out2, ref2, atol=1e-5, rtol=1e-5), (out2, ref2)

    # Explicit small tile -> 4 grid steps with a ragged last block.
    out3 = focal_loss(logits2, targets2, alpha=1.0, gamma=2.0, tile_n=64)
    out3 = jax.block_until_ready(out3)
    assert jnp.allclose(out3, ref2, atol=1e-5, rtol=1e-5), (out3, ref2)

    print("KERNEL_OK")
</pallas_src>

<mosaic_0001>
module attributes {stable_mosaic.version = 11 : i64} {
  func.func @_focal_loss_kernel(%arg0: i32, %arg1: memref<8x32xf32, #tpu.memory_space<vmem>>, %arg2: memref<8x1xi32, #tpu.memory_space<vmem>>, %arg3: memref<1x1xf32, #tpu.memory_space<smem>>) attributes {dimension_semantics = [#tpu.dimension_semantics<parallel>], iteration_bounds = array<i64: 1>, scalar_prefetch = 0 : i64, scratch_operands = 0 : i64, tpu.core_type = #tpu.core_type<tc>, window_params = [{transform_indices = @transform_0, window_bounds = array<i64: 8, 32>}, {transform_indices = @transform_1, window_bounds = array<i64: 8, 1>}, {transform_indices = @transform_2, window_bounds = array<i64: 1, 1>}]} {
    %0 = tpu.iota {dimensions = array<i32: 0>} : vector<8x1xi32>
    %c8_i32 = arith.constant 8 : i32
    %1 = arith.muli %arg0, %c8_i32 : i32
    %2 = vector.broadcast %1 : i32 to vector<8x1xi32>
    %3 = arith.addi %2, %0 : vector<8x1xi32>
    %c8_i32_0 = arith.constant 8 : i32
    %4 = vector.broadcast %c8_i32_0 : i32 to vector<8x1xi32>
    %5 = arith.cmpi slt, %3, %4 : vector<8x1xi32>
    %c0 = arith.constant 0 : index
    %c0_1 = arith.constant 0 : index
    %6 = vector.load %arg1[%c0, %c0_1] : memref<8x32xf32, #tpu.memory_space<vmem>>, vector<8x32xf32>
    %cst = arith.constant 0.000000e+00 : f32
    %7 = vector.shape_cast %5 : vector<8x1xi1> to vector<8x1xi1>
    %8 = vector.broadcast %7 : vector<8x1xi1> to vector<8x32xi1>
    %9 = vector.broadcast %cst : f32 to vector<8x32xf32>
    %10 = arith.select %8, %6, %9 : vector<8x32xi1>, vector<8x32xf32>
    %c0_2 = arith.constant 0 : index
    %c0_3 = arith.constant 0 : index
    %11 = vector.load %arg2[%c0_2, %c0_3] : memref<8x1xi32, #tpu.memory_space<vmem>>, vector<8x1xi32>
    %cst_4 = arith.constant dense<0xFF800000> : vector<8xf32>
    %12 = vector.multi_reduction <maximumf>, %10, %cst_4 [1] : vector<8x32xf32> to vector<8xf32>
    %13 = vector.shape_cast %12 : vector<8xf32> to vector<8x1xf32>
    %14 = vector.broadcast %13 : vector<8x1xf32> to vector<8x32xf32>
    %15 = arith.subf %10, %14 : vector<8x32xf32>
    %16 = math.exp %15 : vector<8x32xf32>
    %cst_5 = arith.constant dense<0.000000e+00> : vector<8xf32>
    %17 = vector.multi_reduction <add>, %16, %cst_5 [1] : vector<8x32xf32> to vector<8xf32>
    %18 = vector.shape_cast %17 : vector<8xf32> to vector<8x1xf32>
    %19 = tpu.iota {dimensions = array<i32: 1>} : vector<8x32xi32>
    %20 = vector.broadcast %11 : vector<8x1xi32> to vector<8x32xi32>
    %21 = arith.cmpi eq, %19, %20 : vector<8x32xi32>
    %cst_6 = arith.constant 0.000000e+00 : f32
    %22 = vector.broadcast %cst_6 : f32 to vector<8x32xf32>
    %23 = arith.select %21, %15, %22 : vector<8x32xi1>, vector<8x32xf32>
    %cst_7 = arith.constant dense<0.000000e+00> : vector<8xf32>
    %24 = vector.multi_reduction <add>, %23, %cst_7 [1] : vector<8x32xf32> to vector<8xf32>
    %25 = vector.shape_cast %24 : vector<8xf32> to vector<8x1xf32>
    %26 = math.log %18 : vector<8x1xf32>
    %27 = arith.subf %25, %26 : vector<8x1xf32>
    %28 = math.exp %27 : vector<8x1xf32>
    %cst_8 = arith.constant 0.000000e+00 : f32
    %29 = vector.broadcast %cst_8 : f32 to vector<8x1xf32>
    %30 = arith.subf %29, %27 : vector<8x1xf32>
    %cst_9 = arith.constant 1.000000e+00 : f32
    %31 = vector.broadcast %cst_9 : f32 to vector<8x1xf32>
    %32 = arith.subf %31, %28 : vector<8x1xf32>
    %33 = arith.mulf %32, %32 : vector<8x1xf32>
    %34 = arith.mulf %33, %30 : vector<8x1xf32>
    %35 = arith.extui %5 : vector<8x1xi1> to vector<8x1xi32>
    %36 = arith.sitofp %35 : vector<8x1xi32> to vector<8x1xf32>
    %37 = arith.mulf %34, %36 : vector<8x1xf32>
    %38 = vector.shape_cast %37 : vector<8x1xf32> to vector<1x8x1xf32>
    %cst_10 = arith.constant dense<0.000000e+00> : vector<1xf32>
    %39 = vector.multi_reduction <add>, %38, %cst_10 [1, 2] : vector<1x8x1xf32> to vector<1xf32>
    %40 = vector.shape_cast %39 : vector<1xf32> to vector<1x1x1xf32>
    %41 = vector.extract %40[0, 0, 0] : f32 from vector<1x1x1xf32>
    %c0_11 = arith.constant 0 : index
    %c0_12 = arith.constant 0 : index
    %42 = memref.load %arg3[%c0_11, %c0_12] : memref<1x1xf32, #tpu.memory_space<smem>>
    memref.store %41, %arg3[%c0_11, %c0_12] : memref<1x1xf32, #tpu.memory_space<smem>>
    return
  }
  func.func @transform_0(%arg0: i32) -> (i32, i32) {
    %c0_i32 = arith.constant 0 : i32
    %c0_i32_0 = arith.constant 0 : i32
    return %arg0, %c0_i32 : i32, i32
  }
  func.func @transform_1(%arg0: i32) -> (i32, i32) {
    %c0_i32 = arith.constant 0 : i32
    %c0_i32_0 = arith.constant 0 : i32
    return %arg0, %c0_i32 : i32, i32
  }
  func.func @transform_2(%arg0: i32) -> (i32, i32) {
    %c0_i32 = arith.constant 0 : i32
    %c0_i32_0 = arith.constant 0 : i32
    return %c0_i32, %arg0 : i32, i32
  }
}

</mosaic_0001>

<bundles_post_ra>
// kernel: tpu_custom_call.1
= control target key start
LH: loop header
LB: loop body
LE: loop exit
PB: predicated region body
PF: predicated region fallthrough
CT: control target
= control target key end

     0   :  { %vm23_vm0 = vcmask 261120   ;;  %s141_s0 = inlined_call_operand.vmem [shape: f32[8,32], index: 0, kind: input, shape index: {}]   ;;  %s142_s1 = inlined_call_operand.vmem [shape: s32[8,1], index: 1, kind: input, shape index: {}]   ;;  %s143_s2 = inlined_call_operand.hbm [shape: f32[1,1], index: 2, kind: output, shape index: {}]  }
   0x1   :  { %v18_v0 = vld [vmem:[%s141_s0] sm:$0xff] }
   0x2   :  { %7 = vsyncpa [#allocation3], 0  ;;  %v24_v1 = vsel %vm23_vm0, %v18_v0, -inf  ;;  %v103_v2 = vmov 0   ;;  %v22_v3 = vld [vmem:[%s142_s1] sm:$0xff]  ;;  %v33_v7 = vlaneseq  ;;  %vm54_vm2 = vcmask 7168  }
   0x3   :  { %84 = vset.pattern.permute.xlu0 %v103_v2  ;;  %s91_s14 = scalar_lea.hbm %s143_s2, 16 }
   0x4   :  { %25 = vmax.xlane.f32.xlu0 %v24_v1  ;;  %v34_v8 = vand.u32 127, %v33_v7  ;;  %p92_p0 = scmp.ne.s32.totalorder %s143_s2, %s91_s14  ;;  %p95_p1 = scmp.lt.u32.totalorder %s91_s14, %s143_s2 }
   0x6   :  { %p97_p2 = pnand %p95_p1, %p92_p0 }
  0x1a   :  { %36 = vperm.xlu0 %84, %v22_v3  }
  0x91   :  { %v26_v4 = vpop.xlane.xlu0 %25 }
  0x92   :  { %v27_v5 = vsub.f32 %v18_v0, %v26_v4 }
  0x94   :  { %v28_v6 = vmul.f32 1.442695, %v27_v5 }
  0x96   :  { %85 = vpow2.f32 %v28_v6 }
  0x99   :  { %v37_v9 = vpop.permute.xlu0 %36 }
  0x9a   :  { %vm38_vm1 = vcmp.eq.s32.totalorder %v34_v8, %v37_v9 }
  0x9b   :  { %v39_v12 = vsel %vm38_vm1, %v27_v5, 0.0 }
  0x9c   :  { %v40_v13 = vsel %vm23_vm0, %v39_v12, 0.0 }
  0xa0   :  { %v86_v10 = vpop.eup %85 }
  0xa1   :  { %v30_v11 = vsel %vm23_vm0, %v86_v10, 0.0 }
  0xa2   :  { %31 = vadd.xlane.f32.xlu1 %v30_v11 }
  0xa6   :  { %41 = vadd.xlane.f32.xlu1 %v40_v13 }
 0x12f   :  { %v32_v14 = vpop.xlane.xlu1 %31 }
 0x130   :  { %87 = vlog2.f32 %v32_v14 }
 0x133   :  { %v42_v17 = vpop.xlane.xlu1 %41 }
 0x13a   :  { %v88_v15 = vpop.eup %87 }
 0x13b   :  { %v44_v16 = vmul.f32 0.6931472, %v88_v15 }
 0x13d   :  { %v45_v18 = vsub.f32 %v42_v17, %v44_v16 }
 0x13f   :  { %v46_v19 = vmul.f32 1.442695, %v45_v18  ;;  %v48_v22 = vsub.f32 0.0, %v45_v18 }
 0x141   :  { %89 = vpow2.f32 %v46_v19 }
 0x14b   :  { %v90_v20 = vpop.eup %89 }
 0x14c   :  { %v49_v21 = vsub.f32 1.0, %v90_v20 }
 0x14e   :  { %v50_v23 = vmul.f32 %v49_v21, %v49_v21 }
 0x150   :  { %v51_v24 = vmul.f32 %v50_v23, %v48_v22 }
 0x152   :  { %v55_v25 = vsel %vm54_vm2, %v51_v24, 0.0 }
 0x153   :  { %56 = vadd.xlane.f32.xlu1 %v55_v25 }
 0x1e0   :  { %v57_v26 = vpop.xlane.xlu1 %56 }
 0x1e1   :  { %v58_v27 = vrot.slane %v57_v26, 4 }
 0x1e3   :  { %v59_v28 = vadd.f32 %v58_v27, %v57_v26 }
 0x1e5   :  { %v60_v29 = vrot.slane %v59_v28, 2 }
 0x1e7   :  { %v61_v30 = vadd.f32 %v60_v29, %v59_v28 }
 0x1e9   :  { %v62_v31 = vrot.slane %v61_v30, 1 }
 0x1eb   :  { %v63_v32 = vadd.f32 %v62_v31, %v61_v30 }
 0x1ed   :  { %80 = vpush %v63_v32 }
 0x21e   :  { %s81_s0 = spop %80 }
 0x21f   :  { %66 = sst [smem:[#allocation2]] %s81_s0 }
 0x220   :  { %100 = shalt.err (!%p97_p2)
}
 0x221   :  { %s104_s19 = smov [#allocation2]  }
 0x222   :  { %74 = dma.smem_to_hbm %s104_s19, 16, %s143_s2, [#allocation3]  }
 0x223   :  { %101 = dma.done.wait [#allocation3], 16  }
 0x224   :  { %102 = vsyncadd [#allocation3], 4294967280 }
 0x225   :  { %78 = sfence }
 0x226   :  { %79 = vsyncpa [#allocation3], 1 }

</bundles_post_ra>
